<compile_context>
chip_gen: v7x
topology: tpu7x:2x2x1
jax: 0.10.0
libtpu: 0.0.40
codegen_flags: <defaults>
</compile_context>

<pallas_src>
import math

import jax
import jax.numpy as jnp
import numpy as np
from jax.experimental import pallas as pl
from jax.experimental.pallas import tpu as pltpu

# ~4 MiB blocks: ~1-3 us of HBM streaming per step on v6e/v7x, so the ~0.35 us
# fixed per-grid-step overhead drops below ~10%.
_TARGET_TILE_BYTES = 4 * 1024 * 1024
# Requested scoped-VMEM ceiling: safe on v5e/v6e (128 MiB physical) and leaves
# headroom under v7x's 64 MiB physical VMEM.
_VMEM_LIMIT_CAP = 48 * 1024 * 1024


def _build_pe(d_model: int, max_len: int = 100) -> jnp.ndarray:
    """Sinusoidal table identical to the PyTorch __init__:
       pe[:, 0::2] = sin(pos * div), pe[:, 1::2] = cos(pos * div)."""
    position = np.arange(max_len, dtype=np.float32)[:, None]              # [max_len, 1]
    div_term = np.exp(np.arange(0, d_model, 2, dtype=np.float32)
                      * (-math.log(10000.0) / d_model))                   # [ceil(d/2)]
    angles = position * div_term                                          # [max_len, ceil(d/2)]
    pe = np.zeros((max_len, d_model), dtype=np.float32)
    pe[:, 0::2] = np.sin(angles)
    pe[:, 1::2] = np.cos(angles)[:, : d_model // 2]
    return jnp.asarray(pe)


def prepare_pe(pe: jnp.ndarray, seq_len: int, dtype) -> jnp.ndarray:
    """Hoistable per-(T, dtype) prep: slice + cast the tiny table once at init
    instead of launching a separate slice/convert HLO every forward call."""
    return pe[:seq_len, :].astype(dtype)


def _sublane_align(dtype) -> int:
    """f32 -> 8, bf16 -> 16, int8/fp8 -> 32: keeps packed-layout loads/stores
    unmasked and relayout-free."""
    return max(8, 32 // jnp.dtype(dtype).itemsize)


def _pick_tile(total: int, align: int, max_tile: int) -> int:
    """Aligned tile <= max_tile.  Grids use pl.cdiv, so `total` need not divide
    evenly (Pallas masks the ragged final block) — no full-array fallback that
    could blow VMEM on large, non-divisible shapes."""
    if total <= max_tile:
        return total                      # full extent is always a legal block dim
    return max(align, (max_tile // align) * align)


def _pe_add_kernel(x_ref, pe_ref, o_ref):
    # Straight VPU add.  pe's block has a broadcastable leading shape
    # ((tile_t, D) vs (tile_b, tile_t, D), or (1, tile_l) vs (tile_b, tile_l));
    # the in-kernel broadcast is free because this kernel is HBM-bound.
    o_ref[...] = x_ref[...] + pe_ref[...]


def _compiler_params(block_bytes: int) -> pltpu.CompilerParams:
    # 3x the per-step block footprint covers double-buffering with headroom;
    # explicit limit makes the tiling robust on v5e's 16 MiB default budget.
    vmem = int(min(_VMEM_LIMIT_CAP, max(16 * 1024 * 1024, 3 * block_bytes)))
    return pltpu.CompilerParams(
        dimension_semantics=("parallel", "parallel"),
        vmem_limit_bytes=vmem,
    )


def positional_encoding_forward(x: jnp.ndarray, pe: jnp.ndarray, *,
                                donate: bool = False) -> jnp.ndarray:
    """x: [B, T, D]; pe: full [max_len, D] f32 table OR an already-prepared
    [T, D] table in x.dtype (see prepare_pe).  Returns x + pe[:T, :]."""
    B, T, D = x.shape
    dtype = x.dtype
    itemsize = jnp.dtype(dtype).itemsize
    sub = _sublane_align(dtype)

    pe_slice = pe if (pe.shape[0] == T and pe.dtype == dtype) else prepare_pe(pe, T, dtype)
    aliases = {0: 0} if donate else {}

    if D % 128 == 0:
        # Lane-dense already: tile T (sublane-aligned) and fuse as many batch
        # rows per block as fit the tile budget.  pe's block index depends only
        # on the outer (T) grid axis, so its DMA is skipped across consecutive
        # batch-tile steps.
        row_budget = max(1, _TARGET_TILE_BYTES // (D * itemsize))
        tile_t = _pick_tile(T, sub, row_budget)
        tile_b = min(B, max(1, row_budget // tile_t))
        grid = (pl.cdiv(T, tile_t), pl.cdiv(B, tile_b))
        block_bytes = (2 * tile_b * tile_t * D + tile_t * D) * itemsize
        return pl.pallas_call(
            _pe_add_kernel,
            out_shape=jax.ShapeDtypeStruct((B, T, D), dtype),
            grid_spec=pltpu.PrefetchScalarGridSpec(
                num_scalar_prefetch=0,
                grid=grid,
                in_specs=[
                    pl.BlockSpec((tile_b, tile_t, D), lambda t, b: (b, t, 0)),
                    pl.BlockSpec((tile_t, D), lambda t, b: (t, 0)),
                ],
                out_specs=pl.BlockSpec((tile_b, tile_t, D), lambda t, b: (b, t, 0)),
            ),
            compiler_params=_compiler_params(block_bytes),
            input_output_aliases=aliases,
        )(x, pe_slice)

    # Small / non-lane-aligned D (e.g. D=32): flatten (T, D) -> L = T*D so the
    # last dim of every block is lane-dense, avoiding masked partial-lane
    # stores.  pe stays a single (1, L) row (no broadcast materialization in
    # HBM); the sublane broadcast happens inside the kernel for free.
    L = T * D
    x2 = x.reshape(B, L)
    pe2 = pe_slice.reshape(1, L)
    lane_budget = max(128, _TARGET_TILE_BYTES // (sub * itemsize))
    tile_l = _pick_tile(L, 128, lane_budget)
    row_budget = max(1, _TARGET_TILE_BYTES // (tile_l * itemsize))
    tile_b = B if B <= row_budget else max(sub, (row_budget // sub) * sub)
    grid = (pl.cdiv(L, tile_l), pl.cdiv(B, tile_b))
    block_bytes = (2 * tile_b * tile_l + tile_l) * itemsize
    out2 = pl.pallas_call(
        _pe_add_kernel,
        out_shape=jax.ShapeDtypeStruct((B, L), dtype),
        grid_spec=pltpu.PrefetchScalarGridSpec(
            num_scalar_prefetch=0,
            grid=grid,
            in_specs=[
                pl.BlockSpec((tile_b, tile_l), lambda l, b: (b, l)),
                pl.BlockSpec((1, tile_l), lambda l, b: (0, l)),
            ],
            out_specs=pl.BlockSpec((tile_b, tile_l), lambda l, b: (b, l)),
        ),
        compiler_params=_compiler_params(block_bytes),
        input_output_aliases=aliases,
    )(x2, pe2)
    return out2.reshape(B, T, D)


if __name__ == "__main__":
    key = jax.random.PRNGKey(0)
    MAX_LEN = 100
    k1, k2, k3 = jax.random.split(key, 3)

    # Case 1: small d_model (matches the qlib usage) -> flattened lane-dense path.
    B, T, D = 2, 8, 32
    x = jax.random.normal(k1, (B, T, D), dtype=jnp.float32)
    pe = _build_pe(D, MAX_LEN)
    pe_ready = prepare_pe(pe, T, x.dtype)          # hoisted once per (T, dtype)
    out = jax.block_until_ready(positional_encoding_forward(x, pe_ready))
    ref = x + pe[:T, :][None, :, :]
    assert out.shape == (B, T, D)
    assert jnp.allclose(out, ref, atol=1e-6, rtol=1e-6)

    # Case 2: lane-aligned d_model -> 3-D path with batch rows fused per block.
    B2, T2, D2 = 4, 16, 128
    x_b = jax.random.normal(k2, (B2, T2, D2), dtype=jnp.float32)
    pe_b = _build_pe(D2, MAX_LEN)
    out_b = jax.block_until_ready(positional_encoding_forward(x_b, pe_b))
    ref_b = x_b + pe_b[:T2, :][None, :, :]
    assert out_b.shape == (B2, T2, D2)
    assert jnp.allclose(out_b, ref_b, atol=1e-6, rtol=1e-6)

    # Case 3: bf16 activations -> exercises dtype-aware sublane alignment (16).
    # Note: pe is cast to bf16 before the add (kept mem-bound); tolerance covers
    # the tiny numeric difference vs. an f32-accumulated reference.
    B3, T3, D3 = 8, 16, 128
    x_c = jax.random.normal(k3, (B3, T3, D3), dtype=jnp.float32).astype(jnp.bfloat16)
    pe_c = _build_pe(D3, MAX_LEN)
    out_c = jax.block_until_ready(positional_encoding_forward(x_c, pe_c))
    ref_c = (x_c.astype(jnp.float32) + pe_c[:T3, :][None, :, :]).astype(jnp.bfloat16)
    assert out_c.shape == (B3, T3, D3)
    assert jnp.allclose(out_c.astype(jnp.float32), ref_c.astype(jnp.float32),
                        atol=5e-2, rtol=5e-2)

    print("KERNEL_OK")
</pallas_src>

<mosaic_0001>
module attributes {stable_mosaic.version = 11 : i64} {
  func.func @_pe_add_kernel(%arg0: i32, %arg1: i32, %arg2: memref<2x256xf32, #tpu.memory_space<vmem>>, %arg3: memref<1x256xf32, #tpu.memory_space<vmem>>, %arg4: memref<2x256xf32, #tpu.memory_space<vmem>>) attributes {dimension_semantics = [#tpu.dimension_semantics<parallel>, #tpu.dimension_semantics<parallel>], iteration_bounds = array<i64: 1, 1>, scalar_prefetch = 0 : i64, scratch_operands = 0 : i64, tpu.core_type = #tpu.core_type<tc>, window_params = [{transform_indices = @transform_0, window_bounds = array<i64: 2, 256>}, {transform_indices = @transform_1, window_bounds = array<i64: 1, 256>}, {transform_indices = @transform_2, window_bounds = array<i64: 2, 256>}]} {
    %c0 = arith.constant 0 : index
    %c0_0 = arith.constant 0 : index
    %0 = vector.load %arg2[%c0, %c0_0] : memref<2x256xf32, #tpu.memory_space<vmem>>, vector<2x256xf32>
    %c0_1 = arith.constant 0 : index
    %c0_2 = arith.constant 0 : index
    %1 = vector.load %arg3[%c0_1, %c0_2] : memref<1x256xf32, #tpu.memory_space<vmem>>, vector<1x256xf32>
    %2 = vector.broadcast %1 : vector<1x256xf32> to vector<2x256xf32>
    %3 = arith.addf %0, %2 : vector<2x256xf32>
    %c0_3 = arith.constant 0 : index
    %c0_4 = arith.constant 0 : index
    %4 = vector.load %arg4[%c0_3, %c0_4] : memref<2x256xf32, #tpu.memory_space<vmem>>, vector<2x256xf32>
    tpu.vector_store %arg4[%c0_3, %c0_4], %3 {strides = array<i32>} : memref<2x256xf32, #tpu.memory_space<vmem>>, vector<2x256xf32>,
    return
  }
  func.func @transform_0(%arg0: i32, %arg1: i32) -> (i32, i32) {
    %c0_i32 = arith.constant 0 : i32
    return %arg1, %arg0 : i32, i32
  }
  func.func @transform_1(%arg0: i32, %arg1: i32) -> (i32, i32) {
    %c0_i32 = arith.constant 0 : i32
    %c0_i32_0 = arith.constant 0 : i32
    return %c0_i32, %arg0 : i32, i32
  }
  func.func @transform_2(%arg0: i32, %arg1: i32) -> (i32, i32) {
    %c0_i32 = arith.constant 0 : i32
    return %arg1, %arg0 : i32, i32
  }
}

</mosaic_0001>

<bundles_post_ra>
// kernel: tpu_custom_call.1
= control target key start
LH: loop header
LB: loop body
LE: loop exit
PB: predicated region body
PF: predicated region fallthrough
CT: control target
= control target key end

     0   :  { %7 = vsyncpa [#allocation3], 0  ;;  %s157_s0 = inlined_call_operand.hbm [shape: f32[2,256], index: 0, kind: input, shape index: {}]   ;;  %s158_s1 = inlined_call_operand.vmem [shape: f32[1,256], index: 1, kind: input, shape index: {}]   ;;  %s159_s2 = inlined_call_operand.hbm [shape: f32[2,256], index: 2, kind: output, shape index: {}]  }
   0x1   :  { %8 = vsyncpa [#allocation4], 0  ;;  %s112_s9 = smov [#allocation2]   ;;  %s64_s13 = scalar_lea.hbm %s157_s0, 64 }
   0x2   :  { %s15_s10 = sshll.u32 %s112_s9, 4  ;;  %p65_p0 = scmp.ne.s32.totalorder %s157_s0, %s64_s13  ;;  %s16_s10 = int_to_ptr.vmem [resolvable:$true] %s15_s10 }
   0x3   :  { %p68_p1 = scmp.lt.u32.totalorder %s64_s13, %s157_s0 }
   0x5   :  { %p70_p2 = pnand %p68_p1, %p65_p0 }
   0x7   :  { %73 = shalt.err (!%p70_p2)
}
   0x8   :  { %s74_s18 = scalar_lea.vmem %s16_s10, 64  ;;  %p79_p4 = scmp.lt.s32.totalorder %s16_s10, %s16_s10 }
   0x9   :  { %p75_p3 = scmp.ne.s32.totalorder %s16_s10, %s74_s18  ;;  %p80_p5 = scmp.lt.s32.totalorder %s74_s18, %s74_s18 }
   0xb   :  { %p81_p6 = por %p80_p5, %p79_p4 }
   0xd   :  { %p82_p7 = pnand %p81_p6, %p75_p3 }
   0xf   :  { %85 = shalt.err (!%p82_p7)
}
  0x10   :  { %18 = dma.hbm_to_vmem [thread:$0]  %s157_s0, 64, %s16_s10, [#allocation3]  }
  0x11   :  { %108 = dma.done.wait [#allocation3], 64  }
  0x12   :  { %109 = vsyncadd [#allocation3], 4294967232  ;;  %v27_v0 = vlaneseq  ;;  %v113_v1 = vmov 1983009808   ;;  %v25_v7 = vld [vmem:[%s158_s1] sm:$0x3] }
  0x13   :  { %v37_v2 = vunpack.c.l.s4 %v113_v1  ;;  %v24_v12 = vld [vmem:[#allocation2] sm:$0xf]  ;;  %s114_s23 = smov [#allocation5]  }
  0x14   :  { %v28_v3 = vshrl.u32 %v27_v0, 7  ;;  %s52_s0 = sshll.u32 %s114_s23, 4  ;;  %s53_s0 = int_to_ptr.vmem [resolvable:$true] %s52_s0 }
  0x15   :  { %v38_v6 = vunpack.c.0.s8 %v37_v2  ;;  %s86_s24 = scalar_lea.vmem %s53_s0, 64  ;;  %p91_p9 = scmp.lt.s32.totalorder %s53_s0, %s53_s0 }
  0x16   :  { %v29_v4 = vsub.s32 0, %v28_v3  ;;  %v33_v5 = vsub.s32 1, %v28_v3  ;;  %p87_p8 = scmp.ne.s32.totalorder %s53_s0, %s86_s24  ;;  %p92_p10 = scmp.lt.s32.totalorder %s86_s24, %s86_s24 }
  0x17   :  { %v41_v10 = vsub.s32 %v38_v6, %v28_v3 }
  0x18   :  { %v30_v8 = vrot.slane %v25_v7, %v29_v4  ;;  %v34_v9 = vrot.slane %v25_v7, %v33_v5  ;;  %p93_p11 = por %p92_p10, %p91_p9 }
  0x1a   :  { %v35_v11 = vcombine.low %v30_v8, %v34_v9  ;;  %p94_p12 = pnand %p93_p11, %p87_p8 }
  0x1c   :  { %v42_v13 = vrot.slane %v35_v11, %v41_v10 }
  0x1e   :  { %v44_v14 = vadd.f32 %v42_v13, %v24_v12 }
  0x20   :  { %45 = vst [vmem:[#allocation5] sm:$0xf] %v44_v14 }
  0x21   :  { %97 = shalt.err (!%p94_p12)
}
  0x22   :  { %s98_s26 = scalar_lea.hbm %s159_s2, 64 }
  0x23   :  { %p99_p13 = scmp.ne.s32.totalorder %s159_s2, %s98_s26  ;;  %p102_p0 = scmp.lt.u32.totalorder %s98_s26, %s159_s2 }
  0x25   :  { %p104_p1 = pnand %p102_p0, %p99_p13 }
  0x27   :  { %107 = shalt.err (!%p104_p1)
}
  0x28   :  { %55 = dma.vmem_to_hbm [thread:$0]  %s53_s0, 64, %s159_s2, [#allocation4]  }
  0x29   :  { %110 = dma.done.wait [#allocation4], 64  }
  0x2a   :  { %111 = vsyncadd [#allocation4], 4294967232 }
  0x2b   :  { %59 = vsyncpa [#allocation3], 1 }
  0x2c   :  { %60 = vsyncpa [#allocation4], 1 }

</bundles_post_ra>
